<compile_context>
chip_gen: v7x
topology: tpu7x:2x2x1
jax: 0.10.0
libtpu: 0.0.40
codegen_flags: <defaults>
</compile_context>

<pallas_src>
import math

import jax
import jax.numpy as jnp
from jax import lax
from jax.experimental import pallas as pl
from jax.experimental.pallas import tpu as pltpu

_LANE = 128
_SUBLANE = 8
_MAX_BLOCK_ROWS = 1024   # 1024 x 128 f32 = 512 KiB per input block per grid step


# ---------------------------------------------------------------------------
# Kernel factories (all sizes are static; closed over at trace time)
# ---------------------------------------------------------------------------
def _make_sum_log_kernel(nb_per, block_rows, n_valid, needs_mask):
    """sum(log(x)) with a (1,128) VMEM accumulator; (8,128) output block per core."""

    def kernel(x_ref, out_ref, acc_ref):
        p = pl.program_id(0)
        i = pl.program_id(1)

        @pl.when(i == 0)
        def _():
            acc_ref[...] = jnp.zeros_like(acc_ref[...])

        x = x_ref[...].astype(jnp.float32)
        if needs_mask:
            row0 = (p * nb_per + i) * block_rows
            rows = lax.broadcasted_iota(jnp.int32, x.shape, 0)
            lanes = lax.broadcasted_iota(jnp.int32, x.shape, 1)
            valid = (row0 + rows) * _LANE + lanes < n_valid
            x = jnp.where(valid, x, 1.0)          # log(1) == 0 -> no contribution
        # EUP does the logs; accumulator update is a plain VPU add.
        acc_ref[...] += jnp.sum(jnp.log(x), axis=0, keepdims=True)

        @pl.when(i == pl.num_programs(1) - 1)
        def _():
            out_ref[...] = jnp.zeros_like(out_ref[...])
            out_ref[0:1, :] = acc_ref[...]

    return kernel


def _make_sum_sq_diff_kernel(nb_per, block_rows, n_valid, needs_mask, n_preds):
    """sum((pred_k - target)^2) for k = 1..n_preds, sharing one load of target."""

    def kernel(*refs):
        t_ref = refs[0]
        pred_refs = refs[1:1 + n_preds]
        out_refs = refs[1 + n_preds:1 + 2 * n_preds]
        acc_refs = refs[1 + 2 * n_preds:]

        p = pl.program_id(0)
        i = pl.program_id(1)

        @pl.when(i == 0)
        def _():
            for acc in acc_refs:
                acc[...] = jnp.zeros_like(acc[...])

        t = t_ref[...].astype(jnp.float32)
        if needs_mask:
            row0 = (p * nb_per + i) * block_rows
            rows = lax.broadcasted_iota(jnp.int32, t.shape, 0)
            lanes = lax.broadcasted_iota(jnp.int32, t.shape, 1)
            valid = (row0 + rows) * _LANE + lanes < n_valid

        for k in range(n_preds):
            d = pred_refs[k][...].astype(jnp.float32) - t
            if needs_mask:
                d = jnp.where(valid, d, 0.0)
            acc_refs[k][...] += jnp.sum(d * d, axis=0, keepdims=True)

        @pl.when(i == pl.num_programs(1) - 1)
        def _():
            for k in range(n_preds):
                out_refs[k][...] = jnp.zeros_like(out_refs[k][...])
                out_refs[k][0:1, :] = acc_refs[k][...]

    return kernel


# ---------------------------------------------------------------------------
# Wrappers
# ---------------------------------------------------------------------------
def _lane_major(x):
    """Flatten to (rows, 128) lane-dense 2-D.

    When the element count is a multiple of 128 this is a pure reshape (no copy).
    Otherwise only the <128-element lane tail is padded; the kernel masks it out,
    so the pad value is irrelevant.
    """
    flat = x.reshape(-1)
    n = flat.shape[0]
    rem = n % _LANE
    if rem:
        flat = jnp.pad(flat, (0, _LANE - rem))
    return flat.reshape(-1, _LANE), n


def _grid_geometry(rows):
    block_rows = _MAX_BLOCK_ROWS if rows >= _MAX_BLOCK_ROWS else rows
    nb = pl.cdiv(rows, block_rows)
    num_cores = 2 if nb >= 2 else 1        # megacore split (v7x); serial elsewhere
    nb_per = pl.cdiv(nb, num_cores)
    return block_rows, nb, num_cores, nb_per


def _data_index_map(nb, num_cores, nb_per):
    if num_cores * nb_per == nb:
        return lambda p, i: (p * nb_per + i, 0)
    # Trailing logical blocks of the last core fall past the array end: clamp the
    # block index (the in-kernel element mask zeroes their contribution).
    return lambda p, i: (jnp.minimum(p * nb_per + i, nb - 1), 0)


def sum_log(x):
    """sum(log(x)) over all elements of x (Pallas grid reduction)."""
    x2, n = _lane_major(x)
    rows = x2.shape[0]
    block_rows, nb, num_cores, nb_per = _grid_geometry(rows)
    needs_mask = (num_cores * nb_per * block_rows * _LANE) != n

    kernel = _make_sum_log_kernel(nb_per, block_rows, n, needs_mask)
    out = pl.pallas_call(
        kernel,
        out_shape=jax.ShapeDtypeStruct((num_cores * _SUBLANE, _LANE), jnp.float32),
        grid=(num_cores, nb_per),
        in_specs=[pl.BlockSpec((block_rows, _LANE),
                               _data_index_map(nb, num_cores, nb_per))],
        out_specs=pl.BlockSpec((_SUBLANE, _LANE), lambda p, i: (p, 0)),
        scratch_shapes=[pltpu.VMEM((1, _LANE), jnp.float32)],
        compiler_params=pltpu.CompilerParams(
            dimension_semantics=("parallel", "arbitrary")),
    )(x2)
    return jnp.sum(out)


def sum_squared_diffs(target, *preds):
    """sum((pred - target)^2) for each pred, fused into a single pallas_call."""
    for pr in preds:
        assert pr.shape == target.shape
    t2, n = _lane_major(target)
    preds2 = [_lane_major(pr)[0] for pr in preds]
    rows = t2.shape[0]
    block_rows, nb, num_cores, nb_per = _grid_geometry(rows)
    needs_mask = (num_cores * nb_per * block_rows * _LANE) != n
    n_preds = len(preds)

    data_spec = pl.BlockSpec((block_rows, _LANE),
                             _data_index_map(nb, num_cores, nb_per))
    out_spec = pl.BlockSpec((_SUBLANE, _LANE), lambda p, i: (p, 0))
    kernel = _make_sum_sq_diff_kernel(nb_per, block_rows, n, needs_mask, n_preds)
    outs = pl.pallas_call(
        kernel,
        out_shape=tuple(
            jax.ShapeDtypeStruct((num_cores * _SUBLANE, _LANE), jnp.float32)
            for _ in range(n_preds)),
        grid=(num_cores, nb_per),
        in_specs=[data_spec] * (1 + n_preds),
        out_specs=tuple(out_spec for _ in range(n_preds)),
        scratch_shapes=[pltpu.VMEM((1, _LANE), jnp.float32) for _ in range(n_preds)],
        compiler_params=pltpu.CompilerParams(
            dimension_semantics=("parallel", "arbitrary")),
    )(t2, *preds2)
    if not isinstance(outs, (tuple, list)):
        outs = (outs,)
    return tuple(jnp.sum(o) for o in outs)


def rate_distortion_loss(output, target, lmbda=0.01, metrics="mse"):
    """JAX/Pallas equivalent of RateDistortionLoss.forward."""
    N, _, H, W = target.shape
    num_pixels = N * H * W
    n_elems = math.prod(target.shape)

    out = {}
    bpp = jnp.float32(0.0)
    # NOTE: likelihood tensors generally differ in shape, so fusing them into one
    # launch would require a concatenation copy; one large-block launch per tensor.
    for likelihoods in output["likelihoods"].values():
        bpp = bpp + sum_log(likelihoods) / (-math.log(2) * num_pixels)
    out["bpp_loss"] = bpp

    if metrics == "mse":
        (sq_hat,) = sum_squared_diffs(target, output["x_hat"])
        out["dist"] = sq_hat / jnp.float32(n_elems)
        out["loss"] = lmbda * (255.0 ** 2) * out["dist"] + out["bpp_loss"]
    elif metrics == "rl":
        sq_hat, sq_x1 = sum_squared_diffs(target, output["x_hat"], output["x1"])
        out["dist"] = sq_hat / jnp.float32(n_elems)
        out["rl"] = sq_x1 / jnp.float32(n_elems)
        out["loss"] = (lmbda * (255.0 ** 2) * (out["dist"] + out["rl"])
                       + out["bpp_loss"])
    return out


# ---------------------------------------------------------------------------
# Main
# ---------------------------------------------------------------------------
if __name__ == "__main__":
    key = jax.random.PRNGKey(0)
    k_t, k_xh, k_x1, k_ly, k_lz = jax.random.split(key, 5)

    # Small shapes consistent with an image-compression forward pass (NCHW).
    N, C, H, W = 2, 4, 16, 16
    target = jax.random.uniform(k_t, (N, C, H, W), dtype=jnp.float32)
    x_hat = jax.random.uniform(k_xh, (N, C, H, W), dtype=jnp.float32)
    x1 = jax.random.uniform(k_x1, (N, C, H, W), dtype=jnp.float32)

    # Likelihoods in (0, 1] — e.g. latent 'y' and hyper-latent 'z'.
    lik_y = jax.random.uniform(k_ly, (N, 8, H // 4, W // 4), dtype=jnp.float32,
                               minval=0.01, maxval=1.0)
    lik_z = jax.random.uniform(k_lz, (N, 8, H // 8, W // 8), dtype=jnp.float32,
                               minval=0.01, maxval=1.0)

    output = {"likelihoods": {"y": lik_y, "z": lik_z}, "x_hat": x_hat, "x1": x1}

    res = rate_distortion_loss(output, target, lmbda=0.01, metrics="mse")
    jax.block_until_ready(res["loss"])
    res_rl = rate_distortion_loss(output, target, lmbda=0.01, metrics="rl")
    jax.block_until_ready(res_rl["loss"])

    # Cross-check against a plain-JAX reference of the PyTorch module.
    def ref_loss(output, target, lmbda, metrics):
        N_, _, H_, W_ = target.shape
        num_pixels = N_ * H_ * W_
        r = {}
        r["bpp_loss"] = sum(
            jnp.sum(jnp.log(l)) / (-math.log(2) * num_pixels)
            for l in output["likelihoods"].values())
        mse_ = lambda a, b: jnp.mean((a - b) ** 2)
        r["dist"] = mse_(output["x_hat"], target)
        if metrics == "mse":
            r["loss"] = lmbda * 255 ** 2 * r["dist"] + r["bpp_loss"]
        else:
            r["rl"] = mse_(output["x1"], target)
            r["loss"] = lmbda * 255 ** 2 * (r["dist"] + r["rl"]) + r["bpp_loss"]
        return r

    ref_mse = ref_loss(output, target, 0.01, "mse")
    ref_rl = ref_loss(output, target, 0.01, "rl")
    for k in ("bpp_loss", "dist", "loss"):
        assert jnp.allclose(res[k], ref_mse[k], rtol=1e-5, atol=1e-6), k
    for k in ("bpp_loss", "dist", "rl", "loss"):
        assert jnp.allclose(res_rl[k], ref_rl[k], rtol=1e-5, atol=1e-6), k

    print("KERNEL_OK")
</pallas_src>

<mosaic_0001>
module attributes {stable_mosaic.version = 11 : i64} {
  func.func @kernel(%arg0: i32, %arg1: i32, %arg2: memref<2x128xf32, #tpu.memory_space<vmem>>, %arg3: memref<8x128xf32, #tpu.memory_space<vmem>>, %arg4: memref<1x128xf32, #tpu.memory_space<vmem>>) attributes {dimension_semantics = [#tpu.dimension_semantics<parallel>, #tpu.dimension_semantics<arbitrary>], iteration_bounds = array<i64: 1, 1>, scalar_prefetch = 0 : i64, scratch_operands = 1 : i64, tpu.core_type = #tpu.core_type<tc>, window_params = [{transform_indices = @transform_0, window_bounds = array<i64: 2, 128>}, {transform_indices = @transform_1, window_bounds = array<i64: 8, 128>}]} {
    %c0_i32 = arith.constant 0 : i32
    %0 = arith.cmpi eq, %arg1, %c0_i32 : i32
    %1 = arith.extui %0 : i1 to i32
    %c0_i32_0 = arith.constant 0 : i32
    %2 = arith.cmpi ne, %1, %c0_i32_0 : i32
    scf.if %2 {
      %cst_8 = arith.constant 0.000000e+00 : f32
      %13 = vector.broadcast %cst_8 : f32 to vector<1x128xf32>
      %c0_9 = arith.constant 0 : index
      %c0_10 = arith.constant 0 : index
      %14 = vector.load %arg4[%c0_9, %c0_10] : memref<1x128xf32, #tpu.memory_space<vmem>>, vector<1x128xf32>
      tpu.vector_store %arg4[%c0_9, %c0_10], %13 {strides = array<i32>} : memref<1x128xf32, #tpu.memory_space<vmem>>, vector<1x128xf32>,
    } else {
    }
    %c0 = arith.constant 0 : index
    %c0_1 = arith.constant 0 : index
    %3 = vector.load %arg2[%c0, %c0_1] : memref<2x128xf32, #tpu.memory_space<vmem>>, vector<2x128xf32>
    %c0_2 = arith.constant 0 : index
    %c0_3 = arith.constant 0 : index
    %4 = vector.load %arg4[%c0_2, %c0_3] : memref<1x128xf32, #tpu.memory_space<vmem>>, vector<1x128xf32>
    %5 = math.log %3 : vector<2x128xf32>
    %cst = arith.constant dense<0.000000e+00> : vector<128xf32>
    %6 = vector.multi_reduction <add>, %5, %cst [0] : vector<2x128xf32> to vector<128xf32>
    %7 = vector.shape_cast %6 : vector<128xf32> to vector<1x128xf32>
    %8 = arith.addf %4, %7 : vector<1x128xf32>
    %c0_4 = arith.constant 0 : index
    %c0_5 = arith.constant 0 : index
    %9 = vector.load %arg4[%c0_4, %c0_5] : memref<1x128xf32, #tpu.memory_space<vmem>>, vector<1x128xf32>
    tpu.vector_store %arg4[%c0_4, %c0_5], %8 {strides = array<i32>} : memref<1x128xf32, #tpu.memory_space<vmem>>, vector<1x128xf32>,
    %c0_i32_6 = arith.constant 0 : i32
    %10 = arith.cmpi eq, %arg1, %c0_i32_6 : i32
    %11 = arith.extui %10 : i1 to i32
    %c0_i32_7 = arith.constant 0 : i32
    %12 = arith.cmpi ne, %11, %c0_i32_7 : i32
    scf.if %12 {
      %cst_8 = arith.constant 0.000000e+00 : f32
      %13 = vector.broadcast %cst_8 : f32 to vector<8x128xf32>
      %c0_9 = arith.constant 0 : index
      %c0_10 = arith.constant 0 : index
      %14 = vector.load %arg3[%c0_9, %c0_10] : memref<8x128xf32, #tpu.memory_space<vmem>>, vector<8x128xf32>
      tpu.vector_store %arg3[%c0_9, %c0_10], %13 {strides = array<i32>} : memref<8x128xf32, #tpu.memory_space<vmem>>, vector<8x128xf32>,
      %c0_11 = arith.constant 0 : index
      %c0_12 = arith.constant 0 : index
      %15 = vector.load %arg4[%c0_11, %c0_12] : memref<1x128xf32, #tpu.memory_space<vmem>>, vector<1x128xf32>
      %c0_13 = arith.constant 0 : index
      %c0_14 = arith.constant 0 : index
      %16 = vector.load %arg3[%c0_13, %c0_14] : memref<8x128xf32, #tpu.memory_space<vmem>>, vector<1x128xf32>
      tpu.vector_store %arg3[%c0_13, %c0_14], %15 {strides = array<i32>} : memref<8x128xf32, #tpu.memory_space<vmem>>, vector<1x128xf32>,
    } else {
    }
    return
  }
  func.func @transform_0(%arg0: i32, %arg1: i32) -> (i32, i32) {
    %c1_i32 = arith.constant 1 : i32
    %0 = arith.muli %arg0, %c1_i32 : i32
    %1 = arith.addi %0, %arg1 : i32
    %c0_i32 = arith.constant 0 : i32
    %c0_i32_0 = arith.constant 0 : i32
    return %1, %c0_i32 : i32, i32
  }
  func.func @transform_1(%arg0: i32, %arg1: i32) -> (i32, i32) {
    %c0_i32 = arith.constant 0 : i32
    %c0_i32_0 = arith.constant 0 : i32
    return %arg0, %c0_i32 : i32, i32
  }
}

</mosaic_0001>

<bundles_post_ra>
// kernel: tpu_custom_call.1
= control target key start
LH: loop header
LB: loop body
LE: loop exit
PB: predicated region body
PF: predicated region fallthrough
CT: control target
= control target key end

     0   :  { %6 = vsyncpa [#allocation4], 0  ;;  %s155_s0 = inlined_call_operand.hbm [shape: f32[2,128], index: 0, kind: input, shape index: {}]   ;;  %s156_s1 = inlined_call_operand.hbm [shape: f32[8,128], index: 1, kind: output, shape index: {}]  }
   0x1   :  { %7 = vsyncpa [#allocation5], 0  ;;  %s118_s6 = smov [#allocation3]   ;;  %s70_s10 = scalar_lea.hbm %s155_s0, 32 }
   0x2   :  { %s17_s7 = sshll.u32 %s118_s6, 4  ;;  %p71_p0 = scmp.ne.s32.totalorder %s155_s0, %s70_s10  ;;  %s18_s7 = int_to_ptr.vmem [resolvable:$true] %s17_s7 }
   0x3   :  { %p74_p1 = scmp.lt.u32.totalorder %s70_s10, %s155_s0 }
   0x5   :  { %p76_p2 = pnand %p74_p1, %p71_p0 }
   0x7   :  { %79 = shalt.err (!%p76_p2)
}
   0x8   :  { %s80_s15 = scalar_lea.vmem %s18_s7, 32  ;;  %p85_p4 = scmp.lt.s32.totalorder %s18_s7, %s18_s7 }
   0x9   :  { %p81_p3 = scmp.ne.s32.totalorder %s18_s7, %s80_s15  ;;  %p86_p5 = scmp.lt.s32.totalorder %s80_s15, %s80_s15 }
   0xb   :  { %p87_p6 = por %p86_p5, %p85_p4 }
   0xd   :  { %p88_p7 = pnand %p87_p6, %p81_p3 }
   0xf   :  { %91 = shalt.err (!%p88_p7)
}
  0x10   :  { %20 = dma.hbm_to_vmem [thread:$0]  %s155_s0, 32, %s18_s7, [#allocation4]  }
  0x11   :  { %114 = dma.done.wait [#allocation4], 32  }
  0x12   :  { %115 = vsyncadd [#allocation4], 4294967264  ;;  %v119_v0 = vmov 0.0   ;;  %v30_v1 = vld [vmem:[#allocation3] sm:$0x3]  ;;  %vm34_vm0 = vcmask 1041408  }
  0x13   :  { %29 = vst [vmem:[#allocation2] sm:$0x1] %v119_v0  ;;  %47 = vst [vmem:[#allocation6] sm:$0xff] %v119_v0  ;;  %68 = vlog2.f32 %v30_v1  ;;  %s120_s0 = smov [#allocation6]  }
  0x14   :  { %s56_s18 = sshll.u32 %s120_s0, 4  ;;  %s57_s18 = int_to_ptr.vmem [resolvable:$true] %s56_s18 }
  0x15   :  { %s92_s19 = scalar_lea.vmem %s57_s18, 128  ;;  %p97_p9 = scmp.lt.s32.totalorder %s57_s18, %s57_s18 }
  0x16   :  { %p93_p8 = scmp.ne.s32.totalorder %s57_s18, %s92_s19  ;;  %p98_p10 = scmp.lt.s32.totalorder %s92_s19, %s92_s19 }
  0x18   :  { %p99_p11 = por %p98_p10, %p97_p9 }
  0x1a   :  { %v31_v10 = vld [vmem:[#allocation2] sm:$0x1]  ;;  %p100_p12 = pnand %p99_p11, %p93_p8 }
  0x1d   :  { %v69_v2 = vpop.eup %68 }
  0x1e   :  { %v33_v3 = vmul.f32 0.6931472, %v69_v2 }
  0x20   :  { %v35_v4 = vsel %vm34_vm0, %v33_v3, 0.0 }
  0x21   :  { %v36_v5 = vrot.slane %v35_v4, 4 }
  0x23   :  { %v37_v6 = vadd.f32 %v36_v5, %v35_v4 }
  0x25   :  { %v38_v7 = vrot.slane %v37_v6, 2 }
  0x27   :  { %v39_v8 = vadd.f32 %v38_v7, %v37_v6 }
  0x29   :  { %v40_v9 = vrot.slane %v39_v8, 1 }
  0x2b   :  { %v41_v11 = vadd.f32 %v40_v9, %v39_v8 }
  0x2d   :  { %v42_v12 = vadd.f32 %v41_v11, %v31_v10 }
  0x2f   :  { %43 = vst [vmem:[#allocation2] sm:$0x1] %v42_v12 }
  0x36   :  { %v48_v13 = vld [vmem:[#allocation2] sm:$0x1] }
  0x37   :  { %49 = vst [vmem:[#allocation6] sm:$0x1] %v48_v13 }
  0x38   :  { %103 = shalt.err (!%p100_p12)
}
  0x39   :  { %s104_s22 = scalar_lea.hbm %s156_s1, 128 }
  0x3a   :  { %p105_p13 = scmp.ne.s32.totalorder %s156_s1, %s104_s22  ;;  %p108_p0 = scmp.lt.u32.totalorder %s104_s22, %s156_s1 }
  0x3c   :  { %p110_p1 = pnand %p108_p0, %p105_p13 }
  0x3e   :  { %113 = shalt.err (!%p110_p1)
}
  0x3f   :  { %59 = dma.vmem_to_hbm [thread:$0]  %s57_s18, 128, %s156_s1, [#allocation5]  }
  0x40   :  { %116 = dma.done.wait [#allocation5], 128  }
  0x41   :  { %117 = vsyncadd [#allocation5], 4294967168 }
  0x42   :  { %63 = vsyncpa [#allocation4], 1 }
  0x43   :  { %64 = vsyncpa [#allocation5], 1 }

</bundles_post_ra>
